<compile_context>
chip_gen: v7x
topology: tpu7x:2x2x1
jax: 0.10.0
libtpu: 0.0.40
codegen_flags: <defaults>
</compile_context>

<pallas_src>
import math

import jax
import jax.numpy as jnp
from jax import lax
from jax.experimental import pallas as pl
from jax.experimental.pallas import tpu as pltpu

EPS = 1e-5  # torch GroupNorm default eps


# ---------------------------------------------------------------------------
# Fused per-layer kernel (factory bakes in the static config)
# ---------------------------------------------------------------------------
def _make_layer_kernel(*, k, pad, tile_t, n_rows, n_total, residual_scale,
                       has_proj, skip_connections, use_stash):
    """n_rows = float(T), n_total = float(T * Cout)."""

    def kernel(*refs):
        refs = list(refs)
        x_ref = refs.pop(0)
        w_ref = refs.pop(0)                      # (k, Cin, Cout) bf16 taps
        b_ref = refs.pop(0)                      # (1, Cout) conv bias (f32)
        g_ref = refs.pop(0)                      # (1, Cout) GN gamma
        bt_ref = refs.pop(0)                     # (1, Cout) GN beta
        wp_ref = refs.pop(0) if has_proj else None
        o_ref = refs.pop(0)
        xwin_ref = refs.pop(0)                   # (pad + tile, Cin) bf16
        carry_ref = refs.pop(0)                  # (pad, Cin) bf16 halo
        s1_ref = refs.pop(0)                     # (1, Cout) f32: stats -> scale
        s2_ref = refs.pop(0)                     # (1, Cout) f32: stats -> shift
        stash_ref = refs.pop(0) if use_stash else None

        p_idx = pl.program_id(1)                 # 0 = stats pass, 1 = write pass
        t_idx = pl.program_id(2)                 # time-tile index

        def conv_tile():
            # ZeroPad1d(k-1, 0): zero the halo carry at stream start instead of
            # materialising a zeros tile + select every iteration.
            @pl.when(t_idx == 0)
            def _():
                carry_ref[...] = jnp.zeros(carry_ref.shape, jnp.bfloat16)

            # Stage [causal halo | current tile] in bf16 VMEM (matmul precision).
            xwin_ref[0:pad, :] = carry_ref[...]
            xwin_ref[pad:pad + tile_t, :] = x_ref[0].astype(jnp.bfloat16)
            # Trailing `pad` rows of (halo ++ tile) -> halo for the next tile.
            carry_ref[...] = xwin_ref[tile_t:tile_t + pad, :]

            # Conv1d(k, stride=1) as k shifted bf16 matmuls, f32 accumulation.
            # Conv bias is NOT added here; it is folded into the GN shift.
            # TODO(synk): shifted starts are sublane-misaligned by < 8 rows; a
            # pltpu.roll / carry-correction formulation could move that relayout
            # onto the XLU slot if the bundle shows it on the critical path.
            acc = jnp.dot(xwin_ref[pad:pad + tile_t, :], w_ref[k - 1],
                          preferred_element_type=jnp.float32)
            for j in range(k - 1):
                start = pad - (k - 1) + j
                acc = acc + jnp.dot(xwin_ref[start:start + tile_t, :], w_ref[j],
                                    preferred_element_type=jnp.float32)
            return acc

        def accumulate_stats(acc):
            @pl.when(t_idx == 0)
            def _():
                s1_ref[...] = jnp.zeros(s1_ref.shape, jnp.float32)
                s2_ref[...] = jnp.zeros(s2_ref.shape, jnp.float32)
            s1_ref[...] += jnp.sum(acc, axis=0, keepdims=True)
            s2_ref[...] += jnp.sum(acc * acc, axis=0, keepdims=True)

        def finalize(acc):
            # s1/s2 hold the folded GN scale/shift during pass 1 (see below).
            y = jnp.maximum(acc * s1_ref[...] + s2_ref[...], 0.0)
            if skip_connections:
                if has_proj:                     # fused 1x1 conv projection
                    res = jnp.dot(x_ref[0].astype(jnp.bfloat16), wp_ref[...],
                                  preferred_element_type=jnp.float32)
                else:
                    res = x_ref[0].astype(jnp.float32)
                y = (y + res) * residual_scale
            o_ref[0] = y.astype(o_ref.dtype)

        # TODO(synk): nn.Dropout is identity here (inference / p == 0).

        if use_stash:
            # Pass 0 only: conv + stats + stash (pass 1 never re-issues the MXU work).
            @pl.when(p_idx == 0)
            def _():
                acc = conv_tile()
                accumulate_stats(acc)
                stash_ref[t_idx] = acc
        else:
            # Fallback (stash too big for VMEM): recompute the conv each pass.
            acc = conv_tile()

            @pl.when(p_idx == 0)
            def _():
                accumulate_stats(acc)

        # Once per sample, at the start of pass 1: fold GroupNorm(1 group) +
        # conv bias into a single per-channel scale/shift and cache it by
        # overwriting the (no longer needed) stats scratches.
        #   x = acc + bias ; mean = (sum s1 + T*sum b) / (T*C)
        #   E[x^2] = (sum s2 + 2*sum(b*s1) + T*sum(b^2)) / (T*C)
        # TODO(synk): one-pass E[x^2]-mean^2 can cancel for very long T; switch
        # to per-channel compensated stats if that ever matters.
        @pl.when(jnp.logical_and(p_idx == 1, t_idx == 0))
        def _():
            s1 = s1_ref[...]
            s2 = s2_ref[...]
            bias = b_ref[...]
            mean = (jnp.sum(s1) + n_rows * jnp.sum(bias)) / n_total
            ex2 = (jnp.sum(s2) + 2.0 * jnp.sum(bias * s1)
                   + n_rows * jnp.sum(bias * bias)) / n_total
            rstd = lax.rsqrt(ex2 - mean * mean + EPS)
            scale = g_ref[...] * rstd                    # gamma / std
            shift = bt_ref[...] + (bias - mean) * scale  # beta + (b - mean)*scale
            s1_ref[...] = scale
            s2_ref[...] = shift

        # Pass 1: folded GN + ReLU + fused residual, store the output tile.
        @pl.when(p_idx == 1)
        def _():
            if use_stash:
                finalize(stash_ref[t_idx])
            else:
                finalize(acc)

    return kernel


# ---------------------------------------------------------------------------
# Wrappers (glue)
# ---------------------------------------------------------------------------
def _vmem_limit_bytes():
    # v5e/v6e have 128 MiB physical VMEM -> allow ~96 MiB; v7x has 64 MiB ->
    # ~48 MiB.  Falls back to a conservative 48 MiB if the query fails.
    try:
        cap = int(pltpu.get_tpu_info().vmem_capacity_bytes)
        if cap <= 0:
            raise ValueError("bad vmem capacity")
    except Exception:
        cap = 64 * 1024 * 1024
    return max(32 * 1024 * 1024, min(cap * 3 // 4, 96 * 1024 * 1024))


def _pick_tile_t(T, tile_t):
    if tile_t is not None:
        assert T % tile_t == 0, "tile_t must divide T"
        assert tile_t % 8 == 0 or tile_t == T, "tile_t must be 8-aligned"
        return tile_t
    # Cap at 1024 rows: amortizes per-grid-step overhead while keeping
    # (window + residual + output + stash) tiles inside VMEM even at C=512.
    if T <= 1024 or T % 8 != 0:
        return T
    t = 1024
    while T % t != 0:
        t -= 8
    return t


def conv_block(x_btc, w_taps, bias, gamma, beta, wproj, *, residual_scale,
               skip_connections, tile_t=None, out_dtype=jnp.float32,
               use_vmem_stash=None):
    """One fused ConvAggegator block. x_btc: (B, T, Cin) f32 or bf16."""
    B, T, Cin = x_btc.shape
    k, _, Cout = w_taps.shape
    tile = _pick_tile_t(T, tile_t)
    n_tiles = T // tile
    pad = max(8, ((k - 1 + 7) // 8) * 8)          # causal halo rows (8-aligned)
    has_proj = skip_connections and (wproj is not None)
    if skip_connections and not has_proj:
        assert Cin == Cout, "identity residual requires Cin == Cout"

    vmem_limit = _vmem_limit_bytes()
    # Keep the pre-GN f32 stash in VMEM only if it fits the per-generation
    # budget (tight on v7x's 64 MiB); otherwise fall back to recomputing the
    # conv in pass 1 (the previous behaviour).
    stash_bytes = T * Cout * 4
    if use_vmem_stash is None:
        use_vmem_stash = stash_bytes <= max(12 * 1024 * 1024, vmem_limit // 3)

    kern = _make_layer_kernel(
        k=k, pad=pad, tile_t=tile, n_rows=float(T), n_total=float(T * Cout),
        residual_scale=residual_scale, has_proj=has_proj,
        skip_connections=skip_connections, use_stash=use_vmem_stash)

    # TODO(synk): constant-index parameter specs (w/b/gamma/beta/wproj) could be
    # single-buffered (pipeline_mode=pl.Buffered(1)) to save a little VMEM.
    in_specs = [
        pl.BlockSpec((1, tile, Cin), lambda b, p, t: (b, t, 0)),   # x
        pl.BlockSpec((k, Cin, Cout), lambda b, p, t: (0, 0, 0)),   # conv taps (bf16)
        pl.BlockSpec((1, Cout), lambda b, p, t: (0, 0)),           # conv bias
        pl.BlockSpec((1, Cout), lambda b, p, t: (0, 0)),           # gamma
        pl.BlockSpec((1, Cout), lambda b, p, t: (0, 0)),           # beta
    ]
    args = [x_btc, w_taps, bias, gamma, beta]
    if has_proj:
        in_specs.append(pl.BlockSpec((Cin, Cout), lambda b, p, t: (0, 0)))
        args.append(wproj)

    scratch_shapes = [
        pltpu.VMEM((pad + tile, Cin), jnp.bfloat16),   # staged causal window
        pltpu.VMEM((pad, Cin), jnp.bfloat16),          # cross-tile halo carry
        pltpu.VMEM((1, Cout), jnp.float32),            # GN sum   -> folded scale
        pltpu.VMEM((1, Cout), jnp.float32),            # GN sumsq -> folded shift
    ]
    if use_vmem_stash:
        scratch_shapes.append(pltpu.VMEM((n_tiles, tile, Cout), jnp.float32))

    return pl.pallas_call(
        kern,
        out_shape=jax.ShapeDtypeStruct((B, T, Cout), out_dtype),
        grid=(B, 2, n_tiles),
        in_specs=in_specs,
        # Pass 0 never writes the output: park it on block (b, 0, 0) so no
        # uninitialized block is ever flushed to HBM (block index = t * p).
        # This relies on Pallas only writing back an output block when its
        # block index changes, and pass-1 t=0 fully overwrites block (b,0,0)
        # before any flush can happen.
        out_specs=pl.BlockSpec((1, tile, Cout), lambda b, p, t: (b, t * p, 0)),
        scratch_shapes=scratch_shapes,
        compiler_params=pltpu.CompilerParams(
            # B is megacore-parallel; pass/tile axes carry the GN statistics,
            # the causal halo and the stash, so they must stay sequential.
            # TODO(synk): for B==1 on v7x, split the T-tile axis across cores
            # with a cross-core (VMEM_SHARED) partial-stats reduction.
            dimension_semantics=("parallel", "arbitrary", "arbitrary"),
            vmem_limit_bytes=vmem_limit,
        ),
    )(*args)


def conv_aggregator_forward(x_btc, params, *, residual_scale,
                            skip_connections=True, tile_t=None,
                            interlayer_dtype=jnp.bfloat16,
                            use_vmem_stash=None):
    """Full ConvAggegator.forward in (B, T, C) layout.

    Inter-layer activations are emitted in `interlayer_dtype` (bf16 by default
    to halve inter-layer HBM traffic; conv/GN accumulation stays f32 in-kernel).
    The final layer always emits f32.
    """
    scale = math.sqrt(residual_scale)
    x = x_btc
    n = len(params)
    for i, p in enumerate(params):
        out_dtype = jnp.float32 if i == n - 1 else interlayer_dtype
        x = conv_block(x, p["w"], p["b"], p["gamma"], p["beta"], p["wproj"],
                       residual_scale=scale, skip_connections=skip_connections,
                       tile_t=tile_t, out_dtype=out_dtype,
                       use_vmem_stash=use_vmem_stash)
    return x


# ---------------------------------------------------------------------------
# Deterministic parameter init (shapes match the PyTorch __init__)
# ---------------------------------------------------------------------------
def init_params(key, embed, conv_layers):
    params = []
    in_d = embed
    for dim, k, stride in conv_layers:
        assert stride == 1, "residual add requires stride=1 (fairseq default)"
        key, k1, k2, k3, k4, k5 = jax.random.split(key, 6)
        # Conv1d weight (Cout, Cin, k) stored as per-tap matmuls (k, Cin, Cout)
        # (tap j == W[:, :, j].T), bf16 for the MXU (f32 accumulation in-kernel).
        w = (0.1 * jax.random.normal(k1, (k, in_d, dim), jnp.float32)
             ).astype(jnp.bfloat16)
        b = 0.1 * jax.random.normal(k2, (1, dim), jnp.float32)      # conv_bias=True
        gamma = 1.0 + 0.1 * jax.random.normal(k3, (1, dim), jnp.float32)
        beta = 0.1 * jax.random.normal(k4, (1, dim), jnp.float32)
        wproj = ((0.1 * jax.random.normal(k5, (in_d, dim), jnp.float32)
                  ).astype(jnp.bfloat16)
                 if in_d != dim else None)                          # 1x1 conv, no bias
        params.append(dict(w=w, b=b, gamma=gamma, beta=beta, wproj=wproj))
        in_d = dim
    return params


# ---------------------------------------------------------------------------
# Pure-JAX reference (same bf16 matmul inputs, f32 accumulation / GroupNorm)
# ---------------------------------------------------------------------------
def reference_forward(x_btc, params, *, residual_scale, skip_connections=True,
                      interlayer_dtype=jnp.float32):
    scale = math.sqrt(residual_scale)
    x = x_btc
    n = len(params)
    for i, p in enumerate(params):
        residual = x
        w = p["w"]
        k, _, cout = w.shape
        T = x.shape[1]
        xpad = jnp.pad(x.astype(jnp.bfloat16), ((0, 0), (k - 1, 0), (0, 0)))
        y = jnp.zeros((x.shape[0], T, cout), jnp.float32)
        for j in range(k):
            y = y + jnp.einsum("btc,cd->btd", xpad[:, j:j + T, :], w[j],
                               preferred_element_type=jnp.float32)
        y = y + p["b"][None]
        mean = jnp.mean(y, axis=(1, 2), keepdims=True)
        var = jnp.mean((y - mean) ** 2, axis=(1, 2), keepdims=True)
        y = (y - mean) / jnp.sqrt(var + EPS)
        y = y * p["gamma"][None] + p["beta"][None]
        y = jnp.maximum(y, 0.0)
        if skip_connections:
            if p["wproj"] is not None:
                residual = jnp.einsum("btc,cd->btd",
                                      residual.astype(jnp.bfloat16), p["wproj"],
                                      preferred_element_type=jnp.float32)
            else:
                residual = residual.astype(jnp.float32)
            y = (y + residual) * scale
        x = y if i == n - 1 else y.astype(interlayer_dtype)
    return x


# ---------------------------------------------------------------------------
if __name__ == "__main__":
    B, T, embed = 2, 16, 16
    conv_layers = [(16, 3, 1), (32, 2, 1)]   # (dim, kernel, stride)
    residual_scale = 0.5

    key = jax.random.PRNGKey(0)
    key, kx = jax.random.split(key)
    # PyTorch NCT input, transposed once to the kernel's (B, T, C) layout.
    x_bct = jax.random.normal(kx, (B, embed, T), jnp.float32)
    x_btc = jnp.transpose(x_bct, (0, 2, 1))

    params = init_params(key, embed, conv_layers)

    # Test 1: skip connections, bf16 inter-layer activations, tile_t=8 ->
    # two time tiles per sample: exercises the cross-tile halo carry, the
    # VMEM pre-GN stash and the two-pass (accumulated-stats) GroupNorm path.
    out = conv_aggregator_forward(x_btc, params, residual_scale=residual_scale,
                                  skip_connections=True, tile_t=8,
                                  interlayer_dtype=jnp.bfloat16)
    out = jax.block_until_ready(out)
    ref = reference_forward(x_btc, params, residual_scale=residual_scale,
                            skip_connections=True,
                            interlayer_dtype=jnp.bfloat16)
    assert out.shape == (B, T, conv_layers[-1][0])
    assert jnp.allclose(out, ref, atol=2e-2, rtol=2e-2), "mismatch (skip=True)"

    # Test 2: skip_connections=False, f32 inter-layer, single T tile.
    out_ns = conv_aggregator_forward(x_btc, params,
                                     residual_scale=residual_scale,
                                     skip_connections=False,
                                     interlayer_dtype=jnp.float32)
    out_ns = jax.block_until_ready(out_ns)
    ref_ns = reference_forward(x_btc, params, residual_scale=residual_scale,
                               skip_connections=False,
                               interlayer_dtype=jnp.float32)
    assert jnp.allclose(out_ns, ref_ns, atol=5e-3, rtol=5e-3), \
        "mismatch (skip=False)"

    # Test 3: force the no-stash (pass-1 conv recompute) fallback path.
    out_rc = conv_aggregator_forward(x_btc, params,
                                     residual_scale=residual_scale,
                                     skip_connections=True, tile_t=8,
                                     interlayer_dtype=jnp.float32,
                                     use_vmem_stash=False)
    out_rc = jax.block_until_ready(out_rc)
    ref_rc = reference_forward(x_btc, params, residual_scale=residual_scale,
                               skip_connections=True,
                               interlayer_dtype=jnp.float32)
    assert jnp.allclose(out_rc, ref_rc, atol=5e-3, rtol=5e-3), \
        "mismatch (no-stash fallback)"

    print("KERNEL_OK")
</pallas_src>

<mosaic_0001>
module attributes {stable_mosaic.version = 11 : i64} {
  func.func @kernel(%arg0: i32, %arg1: i32, %arg2: i32, %arg3: memref<1x8x16xf32, #tpu.memory_space<vmem>>, %arg4: memref<3x16x16xbf16, #tpu.memory_space<vmem>>, %arg5: memref<1x16xf32, #tpu.memory_space<vmem>>, %arg6: memref<1x16xf32, #tpu.memory_space<vmem>>, %arg7: memref<1x16xf32, #tpu.memory_space<vmem>>, %arg8: memref<1x8x16xbf16, #tpu.memory_space<vmem>>, %arg9: memref<16x16xbf16, #tpu.memory_space<vmem>>, %arg10: memref<8x16xbf16, #tpu.memory_space<vmem>>, %arg11: memref<1x16xf32, #tpu.memory_space<vmem>>, %arg12: memref<1x16xf32, #tpu.memory_space<vmem>>, %arg13: memref<2x8x16xf32, #tpu.memory_space<vmem>>) attributes {dimension_semantics = [#tpu.dimension_semantics<parallel>, #tpu.dimension_semantics<arbitrary>, #tpu.dimension_semantics<arbitrary>], iteration_bounds = array<i64: 2, 2, 2>, scalar_prefetch = 0 : i64, scratch_operands = 5 : i64, tpu.core_type = #tpu.core_type<tc>, window_params = [{transform_indices = @transform_0, window_bounds = array<i64: 1, 8, 16>}, {pipeline_mode = #tpu.pipeline_mode<synchronous>, transform_indices = @transform_1, window_bounds = array<i64: 3, 16, 16>}, {pipeline_mode = #tpu.pipeline_mode<synchronous>, transform_indices = @transform_2, window_bounds = array<i64: 1, 16>}, {pipeline_mode = #tpu.pipeline_mode<synchronous>, transform_indices = @transform_3, window_bounds = array<i64: 1, 16>}, {pipeline_mode = #tpu.pipeline_mode<synchronous>, transform_indices = @transform_4, window_bounds = array<i64: 1, 16>}, {transform_indices = @transform_5, window_bounds = array<i64: 1, 8, 16>}]} {
    %c0_i32 = arith.constant 0 : i32
    %0 = arith.cmpi eq, %arg1, %c0_i32 : i32
    %1 = arith.extui %0 : i1 to i32
    %c0_i32_0 = arith.constant 0 : i32
    %2 = arith.cmpi ne, %1, %c0_i32_0 : i32
    scf.if %2 {
      %c0_i32_5 = arith.constant 0 : i32
      %11 = arith.cmpi eq, %arg2, %c0_i32_5 : i32
      %12 = arith.extui %11 : i1 to i32
      %c0_i32_6 = arith.constant 0 : i32
      %13 = arith.cmpi ne, %12, %c0_i32_6 : i32
      scf.if %13 {
        %cst_45 = arith.constant 0.000000e+00 : bf16
        %54 = vector.broadcast %cst_45 : bf16 to vector<8x16xbf16>
        %c0_46 = arith.constant 0 : index
        %c0_47 = arith.constant 0 : index
        %55 = vector.load %arg10[%c0_46, %c0_47] : memref<8x16xbf16, #tpu.memory_space<vmem>>, vector<8x16xbf16>
        tpu.vector_store %arg10[%c0_46, %c0_47], %54 {strides = array<i32>} : memref<8x16xbf16, #tpu.memory_space<vmem>>, vector<8x16xbf16>,
      } else {
      }
      %c0 = arith.constant 0 : index
      %c0_7 = arith.constant 0 : index
      %14 = vector.load %arg10[%c0, %c0_7] : memref<8x16xbf16, #tpu.memory_space<vmem>>, vector<8x16xbf16>
      %c0_8 = arith.constant 0 : index
      %c0_9 = arith.constant 0 : index
      %15 = vector.load %arg9[%c0_8, %c0_9] : memref<16x16xbf16, #tpu.memory_space<vmem>>, vector<8x16xbf16>
      tpu.vector_store %arg9[%c0_8, %c0_9], %14 {strides = array<i32>} : memref<16x16xbf16, #tpu.memory_space<vmem>>, vector<8x16xbf16>,
      %c0_10 = arith.constant 0 : index
      %c0_11 = arith.constant 0 : index
      %c0_12 = arith.constant 0 : index
      %16 = vector.load %arg3[%c0_10, %c0_11, %c0_12] : memref<1x8x16xf32, #tpu.memory_space<vmem>>, vector<1x8x16xf32>
      %17 = vector.shape_cast %16 : vector<1x8x16xf32> to vector<8x16xf32>
      %18 = arith.truncf %17 : vector<8x16xf32> to vector<8x16xbf16>
      %c8 = arith.constant 8 : index
      %c0_13 = arith.constant 0 : index
      %19 = vector.load %arg9[%c8, %c0_13] : memref<16x16xbf16, #tpu.memory_space<vmem>>, vector<8x16xbf16>
      tpu.vector_store %arg9[%c8, %c0_13], %18 {strides = array<i32>} : memref<16x16xbf16, #tpu.memory_space<vmem>>, vector<8x16xbf16>,
      %c8_14 = arith.constant 8 : index
      %c0_15 = arith.constant 0 : index
      %20 = vector.load %arg9[%c8_14, %c0_15] : memref<16x16xbf16, #tpu.memory_space<vmem>>, vector<8x16xbf16>
      %c0_16 = arith.constant 0 : index
      %c0_17 = arith.constant 0 : index
      %21 = vector.load %arg10[%c0_16, %c0_17] : memref<8x16xbf16, #tpu.memory_space<vmem>>, vector<8x16xbf16>
      tpu.vector_store %arg10[%c0_16, %c0_17], %20 {strides = array<i32>} : memref<8x16xbf16, #tpu.memory_space<vmem>>, vector<8x16xbf16>,
      %c8_18 = arith.constant 8 : index
      %c0_19 = arith.constant 0 : index
      %22 = vector.load %arg9[%c8_18, %c0_19] : memref<16x16xbf16, #tpu.memory_space<vmem>>, vector<8x16xbf16>
      %c2 = arith.constant 2 : index
      %c0_20 = arith.constant 0 : index
      %c0_21 = arith.constant 0 : index
      %23 = vector.load %arg4[%c2, %c0_20, %c0_21] : memref<3x16x16xbf16, #tpu.memory_space<vmem>>, vector<1x16x16xbf16>
      %24 = vector.shape_cast %23 : vector<1x16x16xbf16> to vector<16x16xbf16>
      %cst = arith.constant dense<0.000000e+00> : vector<8x16xf32>
      %25 = tpu.matmul %22, %24, %cst {dimension_numbers = #tpu.dot_dimension_numbers<[1], [0], [0], [1], [0, 0, 1, 1], [], []>} : vector<8x16xbf16>, vector<16x16xbf16>, vector<8x16xf32> -> vector<8x16xf32>
      %c6 = arith.constant 6 : index
      %c0_22 = arith.constant 0 : index
      %26 = vector.load %arg9[%c6, %c0_22] : memref<16x16xbf16, #tpu.memory_space<vmem>>, vector<8x16xbf16>
      %c0_23 = arith.constant 0 : index
      %c0_24 = arith.constant 0 : index
      %c0_25 = arith.constant 0 : index
      %27 = vector.load %arg4[%c0_23, %c0_24, %c0_25] : memref<3x16x16xbf16, #tpu.memory_space<vmem>>, vector<1x16x16xbf16>
      %28 = vector.shape_cast %27 : vector<1x16x16xbf16> to vector<16x16xbf16>
      %cst_26 = arith.constant dense<0.000000e+00> : vector<8x16xf32>
      %29 = tpu.matmul %26, %28, %cst_26 {dimension_numbers = #tpu.dot_dimension_numbers<[1], [0], [0], [1], [0, 0, 1, 1], [], []>} : vector<8x16xbf16>, vector<16x16xbf16>, vector<8x16xf32> -> vector<8x16xf32>
      %30 = arith.addf %25, %29 : vector<8x16xf32>
      %c7 = arith.constant 7 : index
      %c0_27 = arith.constant 0 : index
      %31 = vector.load %arg9[%c7, %c0_27] : memref<16x16xbf16, #tpu.memory_space<vmem>>, vector<8x16xbf16>
      %c1 = arith.constant 1 : index
      %c0_28 = arith.constant 0 : index
      %c0_29 = arith.constant 0 : index
      %32 = vector.load %arg4[%c1, %c0_28, %c0_29] : memref<3x16x16xbf16, #tpu.memory_space<vmem>>, vector<1x16x16xbf16>
      %33 = vector.shape_cast %32 : vector<1x16x16xbf16> to vector<16x16xbf16>
      %cst_30 = arith.constant dense<0.000000e+00> : vector<8x16xf32>
      %34 = tpu.matmul %31, %33, %cst_30 {dimension_numbers = #tpu.dot_dimension_numbers<[1], [0], [0], [1], [0, 0, 1, 1], [], []>} : vector<8x16xbf16>, vector<16x16xbf16>, vector<8x16xf32> -> vector<8x16xf32>
      %35 = arith.addf %30, %34 : vector<8x16xf32>
      %c0_i32_31 = arith.constant 0 : i32
      %36 = arith.cmpi eq, %arg2, %c0_i32_31 : i32
      %37 = arith.extui %36 : i1 to i32
      %c0_i32_32 = arith.constant 0 : i32
      %38 = arith.cmpi ne, %37, %c0_i32_32 : i32
      scf.if %38 {
        %cst_45 = arith.constant 0.000000e+00 : f32
        %54 = vector.broadcast %cst_45 : f32 to vector<1x16xf32>
        %c0_46 = arith.constant 0 : index
        %c0_47 = arith.constant 0 : index
        %55 = vector.load %arg11[%c0_46, %c0_47] : memref<1x16xf32, #tpu.memory_space<vmem>>, vector<1x16xf32>
        tpu.vector_store %arg11[%c0_46, %c0_47], %54 {strides = array<i32>} : memref<1x16xf32, #tpu.memory_space<vmem>>, vector<1x16xf32>,
        %cst_48 = arith.constant 0.000000e+00 : f32
        %56 = vector.broadcast %cst_48 : f32 to vector<1x16xf32>
        %c0_49 = arith.constant 0 : index
        %c0_50 = arith.constant 0 : index
        %57 = vector.load %arg12[%c0_49, %c0_50] : memref<1x16xf32, #tpu.memory_space<vmem>>, vector<1x16xf32>
        tpu.vector_store %arg12[%c0_49, %c0_50], %56 {strides = array<i32>} : memref<1x16xf32, #tpu.memory_space<vmem>>, vector<1x16xf32>,
      } else {
      }
      %c0_33 = arith.constant 0 : index
      %c0_34 = arith.constant 0 : index
      %39 = vector.load %arg11[%c0_33, %c0_34] : memref<1x16xf32, #tpu.memory_space<vmem>>, vector<1x16xf32>
      %cst_35 = arith.constant dense<0.000000e+00> : vector<16xf32>
      %40 = vector.multi_reduction <add>, %35, %cst_35 [0] : vector<8x16xf32> to vector<16xf32>
      %41 = vector.shape_cast %40 : vector<16xf32> to vector<1x16xf32>
      %42 = arith.addf %39, %41 : vector<1x16xf32>
      %c0_36 = arith.constant 0 : index
      %c0_37 = arith.constant 0 : index
      %43 = vector.load %arg11[%c0_36, %c0_37] : memref<1x16xf32, #tpu.memory_space<vmem>>, vector<1x16xf32>
      tpu.vector_store %arg11[%c0_36, %c0_37], %42 {strides = array<i32>} : memref<1x16xf32, #tpu.memory_space<vmem>>, vector<1x16xf32>,
      %c0_38 = arith.constant 0 : index
      %c0_39 = arith.constant 0 : index
      %44 = vector.load %arg12[%c0_38, %c0_39] : memref<1x16xf32, #tpu.memory_space<vmem>>, vector<1x16xf32>
      %45 = arith.mulf %35, %35 : vector<8x16xf32>
      %cst_40 = arith.constant dense<0.000000e+00> : vector<16xf32>
      %46 = vector.multi_reduction <add>, %45, %cst_40 [0] : vector<8x16xf32> to vector<16xf32>
      %47 = vector.shape_cast %46 : vector<16xf32> to vector<1x16xf32>
      %48 = arith.addf %44, %47 : vector<1x16xf32>
      %c0_41 = arith.constant 0 : index
      %c0_42 = arith.constant 0 : index
      %49 = vector.load %arg12[%c0_41, %c0_42] : memref<1x16xf32, #tpu.memory_space<vmem>>, vector<1x16xf32>
      tpu.vector_store %arg12[%c0_41, %c0_42], %48 {strides = array<i32>} : memref<1x16xf32, #tpu.memory_space<vmem>>, vector<1x16xf32>,
      %50 = arith.index_cast %arg2 : i32 to index
      %c0_43 = arith.constant 0 : index
      %c0_44 = arith.constant 0 : index
      %51 = vector.load %arg13[%50, %c0_43, %c0_44] : memref<2x8x16xf32, #tpu.memory_space<vmem>>, vector<1x8x16xf32>
      %52 = vector.shape_cast %51 : vector<1x8x16xf32> to vector<8x16xf32>
      %53 = vector.shape_cast %35 : vector<8x16xf32> to vector<1x8x16xf32>
      tpu.vector_store %arg13[%50, %c0_43, %c0_44], %53 {strides = array<i32>} : memref<2x8x16xf32, #tpu.memory_space<vmem>>, vector<1x8x16xf32>,
    } else {
    }
    %c1_i32 = arith.constant 1 : i32
    %3 = arith.cmpi eq, %arg1, %c1_i32 : i32
    %c0_i32_1 = arith.constant 0 : i32
    %4 = arith.cmpi eq, %arg2, %c0_i32_1 : i32
    %5 = arith.andi %3, %4 : i1
    %6 = arith.extui %5 : i1 to i32
    %c0_i32_2 = arith.constant 0 : i32
    %7 = arith.cmpi ne, %6, %c0_i32_2 : i32
    scf.if %7 {
      %c0 = arith.constant 0 : index
      %c0_5 = arith.constant 0 : index
      %11 = vector.load %arg11[%c0, %c0_5] : memref<1x16xf32, #tpu.memory_space<vmem>>, vector<1x16xf32>
      %c0_6 = arith.constant 0 : index
      %c0_7 = arith.constant 0 : index
      %12 = vector.load %arg12[%c0_6, %c0_7] : memref<1x16xf32, #tpu.memory_space<vmem>>, vector<1x16xf32>
      %c0_8 = arith.constant 0 : index
      %c0_9 = arith.constant 0 : index
      %13 = vector.load %arg5[%c0_8, %c0_9] : memref<1x16xf32, #tpu.memory_space<vmem>>, vector<1x16xf32>
      %14 = vector.shape_cast %11 : vector<1x16xf32> to vector<1x1x16xf32>
      %cst = arith.constant dense<0.000000e+00> : vector<1xf32>
      %15 = vector.multi_reduction <add>, %14, %cst [1, 2] : vector<1x1x16xf32> to vector<1xf32>
      %16 = vector.shape_cast %15 : vector<1xf32> to vector<1x1x1xf32>
      %17 = vector.extract %16[0, 0, 0] : f32 from vector<1x1x1xf32>
      %18 = vector.shape_cast %13 : vector<1x16xf32> to vector<1x1x16xf32>
      %cst_10 = arith.constant dense<0.000000e+00> : vector<1xf32>
      %19 = vector.multi_reduction <add>, %18, %cst_10 [1, 2] : vector<1x1x16xf32> to vector<1xf32>
      %20 = vector.shape_cast %19 : vector<1xf32> to vector<1x1x1xf32>
      %21 = vector.extract %20[0, 0, 0] : f32 from vector<1x1x1xf32>
      %cst_11 = arith.constant 1.600000e+01 : f32
      %22 = arith.mulf %cst_11, %21 : f32
      %23 = arith.addf %17, %22 : f32
      %cst_12 = arith.constant 2.560000e+02 : f32
      %24 = arith.divf %23, %cst_12 : f32
      %25 = vector.shape_cast %12 : vector<1x16xf32> to vector<1x1x16xf32>
      %cst_13 = arith.constant dense<0.000000e+00> : vector<1xf32>
      %26 = vector.multi_reduction <add>, %25, %cst_13 [1, 2] : vector<1x1x16xf32> to vector<1xf32>
      %27 = vector.shape_cast %26 : vector<1xf32> to vector<1x1x1xf32>
      %28 = vector.extract %27[0, 0, 0] : f32 from vector<1x1x1xf32>
      %29 = arith.mulf %13, %11 : vector<1x16xf32>
      %30 = vector.shape_cast %29 : vector<1x16xf32> to vector<1x1x16xf32>
      %cst_14 = arith.constant dense<0.000000e+00> : vector<1xf32>
      %31 = vector.multi_reduction <add>, %30, %cst_14 [1, 2] : vector<1x1x16xf32> to vector<1xf32>
      %32 = vector.shape_cast %31 : vector<1xf32> to vector<1x1x1xf32>
      %33 = vector.extract %32[0, 0, 0] : f32 from vector<1x1x1xf32>
      %cst_15 = arith.constant 2.000000e+00 : f32
      %34 = arith.mulf %cst_15, %33 : f32
      %35 = arith.addf %28, %34 : f32
      %36 = arith.mulf %13, %13 : vector<1x16xf32>
      %37 = vector.shape_cast %36 : vector<1x16xf32> to vector<1x1x16xf32>
      %cst_16 = arith.constant dense<0.000000e+00> : vector<1xf32>
      %38 = vector.multi_reduction <add>, %37, %cst_16 [1, 2] : vector<1x1x16xf32> to vector<1xf32>
      %39 = vector.shape_cast %38 : vector<1xf32> to vector<1x1x1xf32>
      %40 = vector.extract %39[0, 0, 0] : f32 from vector<1x1x1xf32>
      %cst_17 = arith.constant 1.600000e+01 : f32
      %41 = arith.mulf %cst_17, %40 : f32
      %42 = arith.addf %35, %41 : f32
      %cst_18 = arith.constant 2.560000e+02 : f32
      %43 = arith.divf %42, %cst_18 : f32
      %44 = arith.mulf %24, %24 : f32
      %45 = arith.subf %43, %44 : f32
      %cst_19 = arith.constant 9.99999974E-6 : f32
      %46 = arith.addf %45, %cst_19 : f32
      %47 = math.rsqrt %46 : f32
      %c0_20 = arith.constant 0 : index
      %c0_21 = arith.constant 0 : index
      %48 = vector.load %arg6[%c0_20, %c0_21] : memref<1x16xf32, #tpu.memory_space<vmem>>, vector<1x16xf32>
      %49 = vector.broadcast %47 : f32 to vector<1x16xf32>
      %50 = arith.mulf %48, %49 : vector<1x16xf32>
      %c0_22 = arith.constant 0 : index
      %c0_23 = arith.constant 0 : index
      %51 = vector.load %arg7[%c0_22, %c0_23] : memref<1x16xf32, #tpu.memory_space<vmem>>, vector<1x16xf32>
      %52 = vector.broadcast %24 : f32 to vector<1x16xf32>
      %53 = arith.subf %13, %52 : vector<1x16xf32>
      %54 = arith.mulf %53, %50 : vector<1x16xf32>
      %55 = arith.addf %51, %54 : vector<1x16xf32>
      %c0_24 = arith.constant 0 : index
      %c0_25 = arith.constant 0 : index
      %56 = vector.load %arg11[%c0_24, %c0_25] : memref<1x16xf32, #tpu.memory_space<vmem>>, vector<1x16xf32>
      tpu.vector_store %arg11[%c0_24, %c0_25], %50 {strides = array<i32>} : memref<1x16xf32, #tpu.memory_space<vmem>>, vector<1x16xf32>,
      %c0_26 = arith.constant 0 : index
      %c0_27 = arith.constant 0 : index
      %57 = vector.load %arg12[%c0_26, %c0_27] : memref<1x16xf32, #tpu.memory_space<vmem>>, vector<1x16xf32>
      tpu.vector_store %arg12[%c0_26, %c0_27], %55 {strides = array<i32>} : memref<1x16xf32, #tpu.memory_space<vmem>>, vector<1x16xf32>,
    } else {
    }
    %c1_i32_3 = arith.constant 1 : i32
    %8 = arith.cmpi eq, %arg1, %c1_i32_3 : i32
    %9 = arith.extui %8 : i1 to i32
    %c0_i32_4 = arith.constant 0 : i32
    %10 = arith.cmpi ne, %9, %c0_i32_4 : i32
    scf.if %10 {
      %11 = arith.index_cast %arg2 : i32 to index
      %c0 = arith.constant 0 : index
      %c0_5 = arith.constant 0 : index
      %12 = vector.load %arg13[%11, %c0, %c0_5] : memref<2x8x16xf32, #tpu.memory_space<vmem>>, vector<1x8x16xf32>
      %13 = vector.shape_cast %12 : vector<1x8x16xf32> to vector<8x16xf32>
      %c0_6 = arith.constant 0 : index
      %c0_7 = arith.constant 0 : index
      %14 = vector.load %arg11[%c0_6, %c0_7] : memref<1x16xf32, #tpu.memory_space<vmem>>, vector<1x16xf32>
      %15 = vector.broadcast %14 : vector<1x16xf32> to vector<8x16xf32>
      %16 = arith.mulf %13, %15 : vector<8x16xf32>
      %c0_8 = arith.constant 0 : index
      %c0_9 = arith.constant 0 : index
      %17 = vector.load %arg12[%c0_8, %c0_9] : memref<1x16xf32, #tpu.memory_space<vmem>>, vector<1x16xf32>
      %18 = vector.broadcast %17 : vector<1x16xf32> to vector<8x16xf32>
      %19 = arith.addf %16, %18 : vector<8x16xf32>
      %cst = arith.constant 0.000000e+00 : f32
      %20 = vector.broadcast %cst : f32 to vector<8x16xf32>
      %21 = arith.maximumf %19, %20 : vector<8x16xf32>
      %c0_10 = arith.constant 0 : index
      %c0_11 = arith.constant 0 : index
      %c0_12 = arith.constant 0 : index
      %22 = vector.load %arg3[%c0_10, %c0_11, %c0_12] : memref<1x8x16xf32, #tpu.memory_space<vmem>>, vector<1x8x16xf32>
      %23 = vector.shape_cast %22 : vector<1x8x16xf32> to vector<8x16xf32>
      %24 = arith.addf %21, %23 : vector<8x16xf32>
      %cst_13 = arith.constant 0.707106769 : f32
      %25 = vector.broadcast %cst_13 : f32 to vector<8x16xf32>
      %26 = arith.mulf %24, %25 : vector<8x16xf32>
      %27 = arith.truncf %26 : vector<8x16xf32> to vector<8x16xbf16>
      %c0_14 = arith.constant 0 : index
      %c0_15 = arith.constant 0 : index
      %c0_16 = arith.constant 0 : index
      %28 = vector.load %arg8[%c0_14, %c0_15, %c0_16] : memref<1x8x16xbf16, #tpu.memory_space<vmem>>, vector<1x8x16xbf16>
      %29 = vector.shape_cast %28 : vector<1x8x16xbf16> to vector<8x16xbf16>
      %30 = vector.shape_cast %27 : vector<8x16xbf16> to vector<1x8x16xbf16>
      tpu.vector_store %arg8[%c0_14, %c0_15, %c0_16], %30 {strides = array<i32>} : memref<1x8x16xbf16, #tpu.memory_space<vmem>>, vector<1x8x16xbf16>,
    } else {
    }
    return
  }
  func.func @transform_0(%arg0: i32, %arg1: i32, %arg2: i32) -> (i32, i32, i32) {
    %c0_i32 = arith.constant 0 : i32
    %c0_i32_0 = arith.constant 0 : i32
    return %arg0, %arg2, %c0_i32 : i32, i32, i32
  }
  func.func @transform_1(%arg0: i32, %arg1: i32, %arg2: i32) -> (i32, i32, i32) {
    %c0_i32 = arith.constant 0 : i32
    %c0_i32_0 = arith.constant 0 : i32
    %c0_i32_1 = arith.constant 0 : i32
    %c0_i32_2 = arith.constant 0 : i32
    return %c0_i32, %c0_i32_0, %c0_i32_1 : i32, i32, i32
  }
  func.func @transform_2(%arg0: i32, %arg1: i32, %arg2: i32) -> (i32, i32) {
    %c0_i32 = arith.constant 0 : i32
    %c0_i32_0 = arith.constant 0 : i32
    %c0_i32_1 = arith.constant 0 : i32
    return %c0_i32, %c0_i32_0 : i32, i32
  }
  func.func @transform_3(%arg0: i32, %arg1: i32, %arg2: i32) -> (i32, i32) {
    %c0_i32 = arith.constant 0 : i32
    %c0_i32_0 = arith.constant 0 : i32
    %c0_i32_1 = arith.constant 0 : i32
    return %c0_i32, %c0_i32_0 : i32, i32
  }
  func.func @transform_4(%arg0: i32, %arg1: i32, %arg2: i32) -> (i32, i32) {
    %c0_i32 = arith.constant 0 : i32
    %c0_i32_0 = arith.constant 0 : i32
    %c0_i32_1 = arith.constant 0 : i32
    return %c0_i32, %c0_i32_0 : i32, i32
  }
  func.func @transform_5(%arg0: i32, %arg1: i32, %arg2: i32) -> (i32, i32, i32) {
    %0 = arith.muli %arg2, %arg1 : i32
    %c0_i32 = arith.constant 0 : i32
    %c0_i32_0 = arith.constant 0 : i32
    return %arg0, %0, %c0_i32 : i32, i32, i32
  }
}

</mosaic_0001>

<bundles_post_ra>
// kernel: tpu_custom_call.1
= control target key start
LH: loop header
LB: loop body
LE: loop exit
PB: predicated region body
PF: predicated region fallthrough
CT: control target
= control target key end

     0   :  { %s1553_s0 = inlined_call_operand.hbm [shape: f32[2,16,16], index: 0, kind: input, shape index: {}]   ;;  %s1554_s1 = inlined_call_operand.hbm [shape: bf16[3,16,16], index: 1, kind: input, shape index: {}]   ;;  %s1555_s2 = inlined_call_operand.vmem [shape: f32[1,16], index: 2, kind: input, shape index: {}]   ;;  %s1556_s3 = inlined_call_operand.vmem [shape: f32[1,16], index: 3, kind: input, shape index: {}]   ;;  %s1557_s4 = inlined_call_operand.vmem [shape: f32[1,16], index: 4, kind: input, shape index: {}]   ;;  %s1558_s5 = inlined_call_operand.hbm [shape: bf16[2,16,16], index: 5, kind: output, shape index: {}]  }
   0x1   :  { %1576 = sst [smem:[#allocation26_spill]] %s1554_s1 }
   0x2   :  { %1577 = sst [smem:[#allocation27_spill]] %s1555_s2 }
   0x3   :  { %1578 = sst [smem:[#allocation28_spill]] %s1556_s3 }
   0x4   :  { %1579 = sst [smem:[#allocation29_spill]] %s1557_s4 }
   0x5   :  { %1580 = sst [smem:[#allocation30_spill]] %s1558_s5 }
   0x6   :  { %10 = vsyncpa [#allocation8], 0 }
   0x7   :  { %12 = vsyncpa [#allocation8 + $0x1], 0 }
   0x8   :  { %13 = vsyncpa [#allocation11], 0 }
   0x9   :  { %14 = vsyncpa [#allocation9], 0 }
   0xa   :  { %16 = vsyncpa [#allocation9 + $0x1], 0  ;;  %s1209_s18 = smov 0   ;;  %s1211_s19 = smov 0  }
   0xb   :  { %s1213_s20 = smov 0   ;;  %s1215_s21 = smov 0  }
   0xc   :  { %s1217_s22 = smov 0   ;;  %s1219_s23 = smov 0  }
   0xd   :  { %s1221_s24 = smov 0   ;;  %s1223_s25 = smov 0  }
   0xe   :  { %s1225_s26 = smov 0   ;;  %s1227_s27 = smov 0  }
   0xf   :  { %s1229_s28 = smov 0   ;;  %s1231_s29 = smov 0  }
  0x10   :  { %s1233_s30 = smov 0  }
  0x11 LB: > { %1581 = sst [smem:[#allocation16_spill]] %s1120_s18  ;;  %s754_s6 = sadd.s32 4294967295, %s1168_s30   ;;  %s1168_s30 = sphi %s1233_s30, %s22_s30   ;;  %s1164_s29 = sphi %s1231_s29, %s1642_s29   ;;  %s1160_s28 = sphi %s1229_s28, %s1641_s28   ;;  %s1156_s27 = sphi %s1227_s27, %s1640_s27   ;;  %s1152_s26 = sphi %s1225_s26, %s1639_s26   ;;  %s1148_s25 = sphi %s1223_s25, %s1630_s25   ;;  %s1144_s24 = sphi %s1221_s24, %s1638_s24   ;;  %s1140_s23 = sphi %s1219_s23, %s1637_s23   ;;  %s1136_s22 = sphi %s1217_s22, %s1636_s22   ;;  %s1132_s21 = sphi %s1215_s21, %s1635_s21   ;;  %s1128_s20 = sphi %s1213_s20, %s1634_s20   ;;  %s1124_s19 = sphi %s1211_s19, %s1633_s19   ;;  %s1120_s18 = sphi %s1209_s18, %s1629_s18  }
  0x12   : > { %1582 = sst [smem:[#allocation17_spill]] %s1124_s19  ;;  %s755_s7 = sadd.s32 4294967294, %s1168_s30  }
  0x13   : > { %1583 = sst [smem:[#allocation18_spill]] %s1144_s24  ;;  %p63_p0 = scmp.ne.s32.totalorder %s1136_s22, %s1132_s21 }
  0x14   : > { %1584 = sst [smem:[#allocation19_spill]] %s1148_s25  ;;  %p1275_p1 = scmp.eq.s32.totalorder %s754_s6, 0 }
  0x15   : > { %1585 = sst [smem:[#allocation20_spill]] %s1152_s26  ;;  %p174_p2 = scmp.ne.s32.totalorder %s1128_s20, %s1124_s19 }
  0x16   : > { %1586 = sst [smem:[#allocation21_spill]] %s1160_s28  ;;  %p175_p3 = scmp.eq.s32.totalorder %s754_s6, 7 }
  0x17   : > { %s1587_s8 = scalar_select %p1275_p1, 1, 0 }
  0x18   : > { %p1283_p4 = por %p1275_p1, %p63_p0  ;;  %p180_p5 = scmp.ne.s32.totalorder %s1124_s19, %s1120_s18 }
  0x19   : > { %p1289_p6 = por %p175_p3, %p174_p2  ;;  %p181_p7 = scmp.eq.s32.totalorder %s755_s7, 7 }
  0x1a   : > { %s1588_s9 = scalar_select %p1283_p4, 1, 0 }
  0x1b   : > { %s1589_s10 = scalar_select %p1289_p6, 1, 0 }
  0x1c   : > { %p756_p8 = scmp.ge.s32.totalorder %s1168_s30, 1  ;;  %p188_p9 = scmp.lt.s32.totalorder %s1168_s30, 9 }
  0x1d   : > { %1590 = sst [smem:[#allocation22_spill]] %s1589_s10  ;;  %p1295_p10 = por %p181_p7, %p180_p5 }
  0x1e   : > { %p1299_p11 = pnand %p756_p8, %p188_p9  ;;  %s1170_s13 = smov [#allocation10]  }
  0x1f   : > { %s1591_s11 = scalar_select %p1295_p10, 1, 0 }
  0x20   : > { %s1593_s12 = scalar_select %p1299_p11, 1, 0 }
  0x21   : > { %1592 = sst [smem:[#allocation23_spill]] %s1591_s11  ;;  %s200_s14 = sshll.u32 %s1170_s13, 4  ;;  %s201_s14 = int_to_ptr.vmem [resolvable:$true] %s200_s14 }
  0x22   : > { %p835_p12 = pneg %p1299_p11  ;;  %s1595_s1 = sld [smem:[#allocation26_spill]] }
  0x24   : > { %p1307_p13 = pnand %p835_p12, %p1275_p1 }
  0x26   : > { %p970_p2 = pneg %p1307_p13 }
  0x28   : > { %s968_s21 = scalar_lea.hbm %s1595_s1, 384 }
  0x29   : > { %p969_p0 = scmp.ne.s32.totalorder %s1595_s1, %s968_s21  ;;  %p975_p7 = scmp.lt.u32.totalorder %s968_s21, %s1595_s1 }
  0x2b   : > { %p971_p3 = pnand %p970_p2, %p969_p0 }
  0x2d   : > { %p972_p5 = pneg %p971_p3 }
  0x2f   : > { %p977_p8 = pnand %p975_p7, %p972_p5 }
  0x31   : > { %980 = shalt.err (!%p977_p8)
}
  0x32   : > { %s981_s18 = scalar_lea.vmem %s201_s14, 384  ;;  %p989_p6 = scmp.lt.s32.totalorder %s201_s14, %s201_s14 }
  0x33   : > { %p982_p9 = scmp.ne.s32.totalorder %s201_s14, %s981_s18  ;;  %p990_p1 = scmp.lt.s32.totalorder %s981_s18, %s981_s18 }
  0x35   : > { %p984_p12 = pnand %p982_p9, %p970_p2  ;;  %p991_p4 = por %p990_p1, %p989_p6 }
  0x37   : > { %p985_p10 = pneg %p984_p12 }
  0x39   : > { %p992_p11 = pnand %p991_p4, %p985_p10 }
  0x3b   : > { %995 = shalt.err (!%p992_p11)
}
  0x3c   : > { %s1171_s16 = smov 64   ;;  %s1172_s11 = smov 4  }
  0x3d   : > { %838 = dma.hbm_to_vmem [thread:$0]  (!%p1307_p13), %s1595_s1, 384, %s201_s14, [#allocation11], %s1171_s16, %s1171_s16, %s1172_s11  }
  0x3e   : > { %s34_s21 = sadd.s32 1, %s1156_s27  ;;  %s37_s6 = sadd.s32 1, %s1160_s28 }
  0x3f   : > { %p35_p1 = scmp.ge.s32.totalorder %s34_s21, 2  ;;  %s41_s7 = sadd.s32 1, %s1164_s29 }
  0x40   : > { %s50_s13 = sadd.s32 1, %s1140_s23  ;;  %p57_p4 = scmp.ne.s32.totalorder %s1140_s23, %s1136_s22 }
  0x41   : > { %s1644_s21 = smov (%p35_p1, %s34_s21), 0  ;;  %s1646_s6 = smov (!%p35_p1, %s37_s6), %s1160_s28 }
  0x42   : > { %1596 = sst [smem:[#allocation24_spill]] %s1644_s21  ;;  %s46_s15 = ssub.s32 %s1156_s27, %s1644_s21 }
  0x43   : > { %p58_p6 = scmp.eq.s32.totalorder %s1168_s30, 0  ;;  %p39_p10 = scmp.ge.s32.totalorder %s1646_s6, 2 }
  0x44   : > { %s157_s14 = smul.u32 %s1156_s27, %s1160_s28  ;;  %s164_s11 = sadd.s32 1, %s1128_s20 }
  0x45   : > { %p1341_p11 = por %p58_p6, %p57_p4  ;;  %s1648_s6 = smov (%p39_p10, %s1646_s6), 0 }
  0x46   : > { %1598 = sst [smem:[#allocation25_spill]] %s1648_s6  ;;  %s1650_s7 = smov (!%p39_p10, %s41_s7), %s1164_s29 }
  0x47   : > { %s158_s18 = smul.u32 %s1648_s6, %s1644_s21  ;;  %p848_p13 = scmp.lt.s32.totalorder %s1168_s30, 8 }
  0x48   : > { %p43_p0 = scmp.ge.s32.totalorder %s1650_s7, 2  ;;  %s223_s17 = sand.u32 1, %s1140_s23  }
  0x49   : > { %s160_s1 = ssub.s32 %s157_s14, %s158_s18  ;;  %s759_s28 = sshll.u32 %s223_s17, 3 }
  0x4a   : > { %s1652_s7 = smov (%p43_p0, %s1650_s7), 0  ;;  %s760_s5 = sshll.u32 %s1164_s29, 1 }
  0x4b   : > { %s45_s10 = ssub.s32 %s1164_s29, %s1652_s7  ;;  %s232_s3 = sadd.s32 %s1156_s27, %s760_s5 }
  0x4c   : > { %s47_s26 = sor.u32 %s46_s15, %s45_s10  ;;  %s161_s4 = sor.u32 %s160_s1, %s45_s10 }
  0x4d   : > { %p48_p2 = scmp.eq.s32.totalorder %s47_s26, 0  ;;  %p162_p3 = scmp.eq.s32.totalorder %s161_s4, 0 }
  0x4e   : > { %s227_s6 = scalar_lea.vmem [#allocation7], %s759_s28  ;;  %s761_s14 = sshll.u32 %s232_s3, 7 }
  0x4f   : > { %s236_s21 = sshll.u32 %s227_s6, 4  ;;  %s1370_s19 = scalar_lea.hbm %s1553_s0, %s761_s14  ;;  %s1365_s21 = int_to_ptr.vmem [resolvable:$true] %s236_s21 }
  0x50   : > { %s1360_s2 = scalar_select %p48_p2, %s1140_s23, %s50_s13  }
  0x51   : > { %s1363_s24 = scalar_select %p162_p3, %s1128_s20, %s164_s11  }
  0x52   : > { %p1376_p5 = pnand %p848_p13, %p1341_p11  ;;  %s224_s3 = scalar_lea.sflag [#allocation8], %s223_s17 }
  0x53   : > { %s996_s4 = scalar_lea.hbm %s1370_s19, 128  ;;  %s1001_s26 = scalar_lea.hbm %s1553_s0, 512 }
  0x54   : > { %p997_p7 = scmp.ne.s32.totalorder %s1370_s19, %s996_s4  ;;  %p998_p8 = pneg %p1376_p5 }
  0x55   : > { %p1002_p1 = scmp.lt.u32.totalorder %s1370_s19, %s1553_s0  ;;  %p1003_p4 = scmp.lt.u32.totalorder %s1001_s26, %s996_s4 }
  0x56   : > { %p999_p9 = pnand %p998_p8, %p997_p7  ;;  %p1005_p10 = scmp.lt.u32.totalorder %s996_s4, %s1370_s19 }
  0x57   : > { %p1004_p6 = por %p1003_p4, %p1002_p1 }
  0x58   : > { %p1000_p12 = pneg %p999_p9 }
  0x59   : > { %p1006_p11 = por %p1005_p10, %p1004_p6 }
  0x5b   : > { %p1007_p13 = pnand %p1006_p11, %p1000_p12 }
  0x5d   : > { %1010 = shalt.err (!%p1007_p13)
}
  0x5e   : > { %s1011_s6 = scalar_lea.vmem %s1365_s21, 128  ;;  %s1173_s13 = smov [#allocation7]  }
  0x5f   : > { %p1012_p0 = scmp.ne.s32.totalorder %s1365_s21, %s1011_s6  ;;  %s1016_s15 = sshll.u32 %s1173_s13, 4  ;;  %s1017_s15 = int_to_ptr.vmem [resolvable:$false] %s1016_s15 }
  0x60   : > { %s1018_s16 = scalar_lea.vmem %s1017_s15, 256  ;;  %p1019_p7 = scmp.lt.s32.totalorder %s1365_s21, %s1017_s15 }
  0x61   : > { %p1014_p2 = pnand %p1012_p0, %p998_p8  ;;  %p1020_p9 = scmp.lt.s32.totalorder %s1018_s16, %s1011_s6 }
  0x63   : > { %p1015_p3 = pneg %p1014_p2  ;;  %p1021_p1 = por %p1020_p9, %p1019_p7 }
  0x65   : > { %p1022_p4 = pnand %p1021_p1, %p1015_p3 }
  0x67   : > { %1025 = shalt.err (!%p1022_p4)
}
  0x68   : > { %842 = dma.hbm_to_vmem [thread:$0]  (!%p1376_p5), %s1370_s19, 128, %s1365_s21, %s224_s3  }
  0x69   : > { %p1600_p12 = scmp.ne.s32.totalorder %s1593_s12, 0 }
  0x6a   : > { %s247_s11 = sand.u32 (!%p1600_p12), 1, %s1136_s22   ;;  %p1601_p8 = scmp.ne.s32.totalorder (!%p1600_p12), %s1588_s9, 0 }
  0x6b   : > { %245 = sbr.rel (%p1600_p12) target bundleno = 766 (0x2fe), region = 40  ;;  %s1408_s17 = sshll.u32 (!%p1600_p12), %s247_s11, 3 }
  0x6c   : > { %s248_s14 = scalar_lea.sflag (!%p1600_p12), [#allocation8], %s247_s11  ;;  %s251_s18 = scalar_lea.vmem (!%p1600_p12), [#allocation7], %s1408_s17 }
  0x72   : > { %1107 = dma.done.wait (%p1601_p8), %s248_s14, 128  }
  0x73   : > { %1109 = vsyncadd (%p1601_p8), %s248_s14, 4294967168  ;;  %p1602_p6 = scmp.ne.s32.totalorder %s1587_s8, 0 }
  0x75   : > { %1111 = dma.done.wait (%p1602_p6), [#allocation11], 384  }
  0x76   : > { %1113 = vsyncadd (%p1602_p6), [#allocation11], 4294966912  ;;  %s1603_s19 = sld [smem:[#allocation17_spill]]  ;;  %s1604_s3 = sld [smem:[#allocation19_spill]] }
  0x7c   : > { %s1575_s12 = sand.u32 1, %s1603_s19   ;;  %p766_p5 = scmp.ne.s32.totalorder %s1604_s3, 0 }
  0x7d   : > { %s1422_s21 = sshll.u32 %s1575_s12, 2  ;;  %s1605_s4 = sld [smem:[#allocation18_spill]] (!%p766_p5) }
  0x7e   : > { %287 = sbr.rel (%p766_p5) target bundleno = 401 (0x191), region = 52 }
  0x83   : > { %p767_p10 = scmp.ne.s32.totalorder (!%p766_p5), %s1605_s4, 0 }
  0x85   : > { %291 = sbr.rel (%p767_p10) target bundleno = 140 (0x8c), region = 56  ;;  %vm292_vm0 = vcmask (!%p767_p10), 125952   ;;  %v1174_v0 = vmov (!%p767_p10), 0  }
  0x86   : > { %293 = vst.msk [vmem:[#allocation3] sm:$0xf] (!%p767_p10), %vm292_vm0, %v1174_v0 }
  0x8c PF: > { %v962_v1 = vld [vmem:[#allocation10 + $0x10] sm:$0xff]   ;;  %v1175_v2 = vmov 0.0   ;;  %vm1176_vm1 = vmmov 0   ;;  %vm295_vm2 = vcmask 125952   ;;  %vm302_vm3 = vcmask 130052   ;;  %v964_v5 = vld [vmem:[#allocation10] sm:$0xff]  }
  0x8d   : > { %798 = vmatprep.subr.bf16.mxu0 %v1175_v2  ;;  %v297_v3 = vld [vmem:[%s251_s18] sm:$0xff]  ;;  %792 = vmatprep.subr.bf16.mxu1 %v1175_v2  ;;  %vm325_vm4 = vcmask 130048   ;;  %v963_v8 = vld [vmem:[#allocation10 + $0x8] sm:$0xff]   ;;  %vm485_vm5 = vcmask (!%p767_p10), 122880   ;;  %v1177_v29 = vmov (!%p767_p10), 0.0  }
  0x8e   : > { %799 = vmatpush3.bf16.msra.mxu0 %v962_v1  ;;  %800 = vmatprep.mubr.msk.bf16.mxu0 %vm1176_vm1, %v1175_v2  ;;  %v298_v4 = vpack.c.bf16 %v297_v3, %v297_v3  ;;  %v294_v6 = vld [vmem:[#allocation3] sm:$0xf]  ;;  %486 = vst.msk [vmem:[#allocation4] sm:$0x1] (!%p767_p10), %vm485_vm5, %v1177_v29  ;;  %487 = vst.msk [vmem:[#allocation5] sm:$0x1] (!%p767_p10), %vm485_vm5, %v1177_v29 }
  0x8f   : > { %804 = vmatprep.subr.bf16.mxu0 %v1175_v2  ;;  %794 = vmatprep.mubr.msk.bf16.mxu1 %vm1176_vm1, %v1175_v2  ;;  %296 = vst.msk [vmem:[#allocation2] sm:$0xf] %vm295_vm2, %v294_v6 }
  0x90   : > { %v300_v7 = vrot.slane %v298_v4, 4  ;;  %793 = vmatpush3.bf16.msra.mxu1 %v964_v5 }
  0x92   : > { %303 = vst.msk [vmem:[#allocation2] sm:$0xf0] %vm302_vm3, %v300_v7 }
  0x99   : > { %v310_v9 = vld [vmem:[#allocation2] sm:$0xf0] }
  0x9a   : > { %v965_v10 = vld [vmem:[#allocation2 + $0x4] ss:$0 sps:$4 sm:$0xff]   ;;  %v370_v11 = vrot.slane %v310_v9, 4 }
  0x9b   : > { %v314_v12 = vld [vmem:[#allocation2] sm:$0x78]  ;;  %309 = vst.msk [vmem:[#allocation3] sm:$0xf] %vm295_vm2, %v965_v10 }
  0x9c   : > { %v420_v13 = vld [vmem:[#allocation2] sm:$0xf8]  ;;  %v318_v14 = vrot.slane %v314_v12, 3  ;;  %801 = vmatmul.mubr.msk.bf16.vlgmr.msra.gmra.mrb[0].mxu0 %vm325_vm4, %v370_v11 }
  0x9d   : > { %v425_v15 = vshrl.u32 %v420_v13, 16  ;;  %v428_v16 = vshll.u32 %v420_v13, 16  ;;  %805 = vmatpush3.bf16.msra.mxu0 %v963_v8  ;;  %806 = vmatprep.mubr.msk.bf16.mxu0 %vm1176_vm1, %v1175_v2 }
  0x9e   : > { %795 = vmatmul.mubr.msk.bf16.vlgmr.msra.gmra.mrb[0].mxu1 %vm325_vm4, %v318_v14 }
  0x9f   : > { %v427_v17 = vrot.slane %v425_v15, 3  ;;  %v430_v18 = vrot.slane %v428_v16, 4 }
  0xa1   : > { %v431_v19 = vor.u32 %v430_v18, %v427_v17 }
  0xa8   : > { %807 = vmatmul.mubr.msk.bf16.vlgmr.msra.gmra.mrb[0].mxu0 %vm325_vm4, %v431_v19 }
 0x171   : > { %v363_v20 = vpop.f32.mrb[0].mxu1 }
 0x172   : > { %v796_v21 = vpop.f32.mrb[1].mxu1 }
 0x173   : > { %v366_v22 = vpop.f32.mrb[2].mxu1 }
 0x174   : > { %v797_v23 = vpop.f32.mrb[3].mxu1 }
 0x178   : > { %484 = sbr.rel (%p767_p10) target bundleno = 383 (0x17f), region = 60 }
 0x17b   : > { %v475_v24 = vpop.f32.mrb[0].mxu0 }
 0x17c   : > { %v810_v25 = vadd.f32 %v475_v24, %v363_v20  ;;  %v808_v26 = vpop.f32.mrb[1].mxu0 }
 0x17d   : > { %v478_v27 = vpop.f32.mrb[2].mxu0 }
 0x17e   : > { %v809_v28 = vpop.f32.mrb[3].mxu0 }
 0x17f PF: > { %s1607_s9 = sld [smem:[#allocation18_spill]]  ;;  %v489_v30 = vsel %vm325_vm4, %v810_v25, 0.0  ;;  %v500_v31 = vmul.f32 %v810_v25, %v810_v25  ;;  %v488_v42 = vld [vmem:[#allocation4] sm:$0x1]  ;;  %vm497_vm6 = vcmask 122880  }
 0x180   : > { %v490_v32 = vrot.slane %v489_v30, 4  ;;  %v499_v45 = vld [vmem:[#allocation5] sm:$0x1] }
 0x181   : > { %v501_v33 = vsel %vm325_vm4, %v500_v31, 0.0 }
 0x182   : > { %v491_v34 = vadd.f32 %v490_v32, %v489_v30  ;;  %v502_v35 = vrot.slane %v501_v33, 4 }
 0x184   : > { %v492_v36 = vrot.slane %v491_v34, 2  ;;  %v503_v37 = vadd.f32 %v502_v35, %v501_v33 }
 0x185   : > { %s776_s5 = sshll.u32 %s1607_s9, 3 }
 0x186   : > { %s511_s25 = scalar_lea.vmem [#allocation6], %s776_s5  ;;  %v493_v38 = vadd.f32 %v492_v36, %v491_v34  ;;  %v504_v39 = vrot.slane %v503_v37, 2 }
 0x187   : > { %512 = vst.msk [vmem:[%s511_s25] sm:$0xff] %vm325_vm4, %v810_v25 }
 0x188   : > { %v494_v40 = vrot.slane %v493_v38, 1  ;;  %v505_v41 = vadd.f32 %v504_v39, %v503_v37 }
 0x18a   : > { %v495_v43 = vadd.f32 %v494_v40, %v493_v38  ;;  %v506_v44 = vrot.slane %v505_v41, 1 }
 0x18c   : > { %v496_v46 = vadd.f32 %v495_v43, %v488_v42  ;;  %v507_v47 = vadd.f32 %v506_v44, %v505_v41 }
 0x18e   : > { %498 = vst.msk [vmem:[#allocation4] sm:$0x1] %vm497_vm6, %v496_v46  ;;  %v508_v48 = vadd.f32 %v507_v47, %v499_v45 }
 0x190   : > { %509 = vst.msk [vmem:[#allocation5] sm:$0x1] %vm497_vm6, %v508_v48 }
 0x191 PF: > { %s1608_s26 = sld [smem:[#allocation19_spill]]  ;;  %s1609_s28 = sld [smem:[#allocation18_spill]] }
 0x197   : > { %p513_p11 = scmp.eq.s32.totalorder %s1608_s26, 1  ;;  %p514_p13 = scmp.eq.s32.totalorder %s1609_s28, 0 }
 0x199   : > { %p515_p0 = pnand %p514_p13, %p513_p11 }
 0x19a   : > { %v520_v49 = vld [vmem:[#allocation5] sm:$0x1] (!%p515_p0)  ;;  %vm522_vm7 = vcmask (!%p515_p0), 122880   ;;  %v519_v50 = vld [vmem:[#allocation4] sm:$0x1] (!%p515_p0)  ;;  %s1610_s13 = sld [smem:[#allocation27_spill]] (!%p515_p0) }
 0x19b   : > { %518 = sbr.rel (%p515_p0) target bundleno = 707 (0x2c3), region = 64  ;;  %v548_v51 = vsel (!%p515_p0), %vm522_vm7, %v520_v49, 0.0  ;;  %v523_v52 = vsel (!%p515_p0), %vm522_vm7, %v519_v50, 0.0  ;;  %s1611_s1 = sld [smem:[#allocation28_spill]] (!%p515_p0) }
 0x19c   : > { %549 = vadd.xlane.f32.xlu1 (!%p515_p0), %v548_v51  ;;  %524 = vadd.xlane.f32.xlu0 (!%p515_p0), %v523_v52 }
 0x1a0   : > { %v1452_v53 = vld [vmem:[%s1610_s13] sm:$0x1] (!%p515_p0) }
 0x1a1   : > { %v558_v54 = vmul.f32 (!%p515_p0), %v1452_v53, %v519_v50  ;;  %v533_v55 = vsel (!%p515_p0), %vm522_vm7, %v1452_v53, 0.0  ;;  %v571_v56 = vmul.f32 (!%p515_p0), %v1452_v53, %v1452_v53  ;;  %v593_v33 = vld [vmem:[%s1611_s1] sm:$0x1] (!%p515_p0) }
 0x1a2   : > { %534 = vadd.xlane.f32.xlu0 %v533_v55 }
 0x1a3   : > { %v559_v57 = vsel %vm522_vm7, %v558_v54, 0.0  ;;  %v572_v58 = vsel %vm522_vm7, %v571_v56, 0.0 }
 0x1a4   : > { %560 = vadd.xlane.f32.xlu1 %v559_v57 }
 0x1a6   : > { %573 = vadd.xlane.f32.xlu0 %v572_v58 }
 0x229   : > { %v550_v59 = vpop.xlane.xlu1 %549  ;;  %v525_v60 = vpop.xlane.xlu0 %524 }
 0x22a   : > { %v551_v61 = vrot.slane %v550_v59, 4  ;;  %v526_v62 = vrot.slane %v525_v60, 4 }
 0x22c   : > { %v552_v63 = vadd.f32 %v551_v61, %v550_v59  ;;  %v527_v0 = vadd.f32 %v526_v62, %v525_v60 }
 0x22e   : > { %v553_v3 = vrot.slane %v552_v63, 2  ;;  %v528_v4 = vrot.slane %v527_v0, 2 }
 0x22f   : > { %v535_v2 = vpop.xlane.xlu0 %534 }
 0x230   : > { %v536_v6 = vrot.slane %v535_v2, 4  ;;  %v529_v9 = vadd.f32 %v528_v4, %v527_v0  ;;  %v554_v11 = vadd.f32 %v553_v3, %v552_v63 }
 0x231   : > { %v561_v1 = vpop.xlane.xlu1 %560 }
 0x232   : > { %v562_v5 = vrot.slane %v561_v1, 4  ;;  %v537_v8 = vadd.f32 %v536_v6, %v535_v2  ;;  %v530_v15 = vrot.slane %v529_v9, 1  ;;  %v555_v20 = vrot.slane %v554_v11, 1 }
 0x233   : > { %v574_v10 = vpop.xlane.xlu0 %573 }
 0x234   : > { %v563_v7 = vadd.f32 %v562_v5, %v561_v1  ;;  %v538_v13 = vrot.slane %v537_v8, 2  ;;  %v575_v14 = vrot.slane %v574_v10, 4  ;;  %v531_v18 = vadd.f32 %v530_v15, %v529_v9 }
 0x235   : > { %v556_v27 = vadd.f32 %v555_v20, %v554_v11 }
 0x236   : > { %v564_v12 = vrot.slane %v563_v7, 2  ;;  %v576_v17 = vadd.f32 %v575_v14, %v574_v10  ;;  %v539_v19 = vadd.f32 %v538_v13, %v537_v8  ;;  %815 = vpush %v531_v18 }
 0x238   : > { %v565_v16 = vadd.f32 %v564_v12, %v563_v7  ;;  %v577_v21 = vrot.slane %v576_v17, 2  ;;  %v540_v22 = vrot.slane %v539_v19, 1 }
 0x23a   : > { %v566_v23 = vrot.slane %v565_v16, 1  ;;  %v578_v24 = vadd.f32 %v577_v21, %v576_v17  ;;  %v541_v25 = vadd.f32 %v540_v22, %v539_v19 }
 0x23c   : > { %v567_v26 = vadd.f32 %v566_v23, %v565_v16  ;;  %817 = vpush %v541_v25  ;;  %v579_v28 = vrot.slane %v578_v24, 1 }
 0x23d   : > { %819 = vpush %v556_v27 }
 0x23e   : > { %821 = vpush %v567_v26  ;;  %v580_v29 = vadd.f32 %v579_v28, %v578_v24 }
 0x240   : > { %823 = vpush %v580_v29 }
 0x267   : > { %s816_s15 = spop %815 }
 0x26d   : > { %s818_s16 = spop %817 }
 0x26e   : > { %s543_s11 = smul.f32 16.0, %s818_s16  ;;  %s820_s14 = spop %819 }
 0x26f   : > { %s822_s19 = spop %821 }
 0x270   : > { %s544_s3 = sadd.f32 %s816_s15, %s543_s11  ;;  %s569_s4 = smul.f32 2.0, %s822_s19 }
 0x271   : > { %s824_s8 = spop %823  ;;  %s1612_s19 = sld [smem:[#allocation29_spill]] }
 0x272   : > { %s547_s9 = smul.f32 0.00390625, %s544_s3  ;;  %s570_s5 = sadd.f32 %s820_s14, %s569_s4 }
 0x273   : > { %s582_s25 = smul.f32 16.0, %s824_s8 }
 0x274   : > { %s587_s28 = smul.f32 %s547_s9, %s547_s9  ;;  %v597_v32 = vstv %s547_s9 }
 0x275   : > { %s583_s26 = sadd.f32 %s582_s25, %s570_s5  ;;  %v598_v36 = vsub.f32 %v1452_v53, %v597_v32 }
 0x277   : > { %s586_s10 = smul.f32 0.00390625, %s583_s26  ;;  %v596_v37 = vld [vmem:[%s1612_s19] sm:$0x1] }
 0x279   : > { %s588_s6 = ssub.f32 %s586_s10, %s587_s28 }
 0x27b   : > { %s589_s13 = sadd.f32 1e-05, %s588_s6 }
 0x27d   : > { %v590_v30 = vstv %s589_s13 }
 0x27e   : > { %966 = vrsqrt.f32 %v590_v30 }
 0x288   : > { %v967_v31 = vpop.eup %966 }
 0x289   : > { %825 = vpush %v967_v31 }
 0x2ba   : > { %s826_s15 = spop %825 }
 0x2bb   : > { %v594_v34 = vstv %s826_s15 }
 0x2bc   : > { %v595_v35 = vmul.f32 %v594_v34, %v593_v33 }
 0x2be   : > { %v599_v38 = vmul.f32 %v598_v36, %v595_v35  ;;  %601 = vst.msk [vmem:[#allocation4] sm:$0x1] %vm522_vm7, %v595_v35 }
 0x2c0   : > { %v600_v39 = vadd.f32 %v599_v38, %v596_v37 }
 0x2c2   : > { %602 = vst.msk [vmem:[#allocation5] sm:$0x1] %vm522_vm7, %v600_v39 }
 0x2c3 PF: > { %s1613_s3 = sld [smem:[#allocation19_spill]] }
 0x2c9   : > { %p777_p2 = scmp.ne.s32.totalorder %s1613_s3, 1 }
 0x2ca   : > { %s1614_s12 = sld [smem:[#allocation18_spill]] (!%p777_p2)  ;;  %v779_v40 = vld [vmem:[#allocation4] ss:$0 sm:$0xff] (!%p777_p2)  ;;  %v780_v42 = vld [vmem:[#allocation5] ss:$0 sm:$0xff] (!%p777_p2)  ;;  %vm630_vm8 = vcmask (!%p777_p2), 125952  }
 0x2cb   : > { %605 = sbr.rel (%p777_p2) target bundleno = 736 (0x2e0), region = 68  ;;  %v626_v45 = vld [vmem:[%s251_s18] sm:$0xff] (!%p777_p2)  ;;  %s1615_s8 = scalar_lea.vmem (!%p777_p2), [#allocation12], %s1422_s21 }
 0x2d0   : > { %s778_s1 = sshll.u32 (!%p777_p2), %s1614_s12, 3 }
 0x2d1   : > { %s607_s4 = scalar_lea.vmem (!%p777_p2), [#allocation6], %s778_s1 }
 0x2d2   : > { %v608_v41 = vld [vmem:[%s607_s4] sm:$0xff] }
 0x2d3   : > { %v616_v43 = vmul.f32 %v779_v40, %v608_v41 }
 0x2d5   : > { %v624_v44 = vadd.f32 %v780_v42, %v616_v43 }
 0x2d7   : > { %v625_v46 = vmax.f32 %v624_v44, 0.0 }
 0x2d9   : > { %v627_v47 = vadd.f32 %v626_v45, %v625_v46 }
 0x2db   : > { %v628_v48 = vmul.f32 0.70710677, %v627_v47 }
 0x2dd   : > { %v629_v49 = vpack.c.bf16 %v628_v48, %v628_v48 }
 0x2df   : > { %631 = vst.msk [vmem:[%s1615_s8] sm:$0xf] %vm630_vm8, %v629_v49 }
 0x2e0 PF: > { %s1616_s9 = sld [smem:[#allocation19_spill]]  ;;  %s1617_s5 = sld [smem:[#allocation18_spill]] }
 0x2e1   : > { %s1618_s25 = sld [smem:[#allocation20_spill]]  ;;  %s1619_s26 = sld [smem:[#allocation17_spill]] }
 0x2e2   : > { %s1620_s28 = sld [smem:[#allocation22_spill]]  ;;  %s1621_s13 = scalar_lea.vmem [#allocation12], %s1422_s21 }
 0x2e3   : > { %s649_s16 = sshll.u32 %s1621_s13, 4  ;;  %s1622_s14 = sld [smem:[#allocation30_spill]]  ;;  %s1481_s16 = int_to_ptr.vmem [resolvable:$true] %s649_s16 }
 0x2e4   : > { %s1026_s1 = scalar_lea.vmem %s1481_s16, 64  ;;  %s1178_s21 = smov [#allocation12]  }
 0x2e5   : > { %p1027_p3 = scmp.ne.s32.totalorder %s1481_s16, %s1026_s1  ;;  %s1030_s4 = sshll.u32 %s1178_s21, 4  ;;  %s1031_s4 = int_to_ptr.vmem [resolvable:$false] %s1030_s4 }
 0x2e6   : > { %s640_s10 = smul.u32 %s1617_s5, %s1616_s9  ;;  %s1032_s8 = scalar_lea.vmem %s1031_s4, 128 }
 0x2e7   : > { %s782_s6 = sshll.u32 %s1618_s25, 1  ;;  %s1623_s3 = sand.u32 1, %s1619_s26  }
 0x2e8   : > { %s645_s17 = sadd.s32 %s782_s6, %s640_s10  ;;  %s633_s12 = scalar_lea.sflag [#allocation9], %s1623_s3 }
 0x2e9   : > { %s783_s18 = sshll.u32 %s645_s17, 6  ;;  %p1624_p7 = scmp.ne.s32.totalorder %s1620_s28, 0 }
 0x2ea   : > { %s647_s19 = scalar_lea.hbm %s1622_s14, %s783_s18  ;;  %p1033_p4 = scmp.lt.s32.totalorder %s1481_s16, %s1031_s4 }
 0x2eb   : > { %p1028_p9 = pnand %p1027_p3, %p1624_p7  ;;  %p1034_p12 = scmp.lt.s32.totalorder %s1032_s8, %s1026_s1 }
 0x2ed   : > { %p1029_p1 = pneg %p1028_p9  ;;  %p1035_p8 = por %p1034_p12, %p1033_p4 }
 0x2ef   : > { %p1036_p6 = pnand %p1035_p8, %p1029_p1 }
 0x2f1   : > { %1039 = shalt.err (!%p1036_p6)
}
 0x2f2   : > { %s1040_s9 = scalar_lea.hbm %s647_s19, 64  ;;  %s1044_s26 = scalar_lea.hbm %s1622_s14, 256 }
 0x2f3   : > { %p1041_p5 = scmp.ne.s32.totalorder %s647_s19, %s1040_s9  ;;  %p1045_p13 = scmp.lt.u32.totalorder %s647_s19, %s1622_s14 }
 0x2f4   : > { %p1046_p0 = scmp.lt.u32.totalorder %s1044_s26, %s1040_s9  ;;  %p1048_p3 = scmp.lt.u32.totalorder %s1040_s9, %s647_s19 }
 0x2f5   : > { %p1042_p10 = pnand %p1041_p5, %p1624_p7 }
 0x2f6   : > { %p1047_p2 = por %p1046_p0, %p1045_p13 }
 0x2f7   : > { %p1043_p11 = pneg %p1042_p10 }
 0x2f8   : > { %p1049_p9 = por %p1048_p3, %p1047_p2 }
 0x2fa   : > { %p1050_p1 = pnand %p1049_p9, %p1043_p11 }
 0x2fc   : > { %1053 = shalt.err (!%p1050_p1)
}
 0x2fd   : > { %833 = dma.vmem_to_hbm [thread:$0]  (%p1624_p7), %s1481_s16, 64, %s647_s19, %s633_s12  }
 0x2fe PF: > { %s1625_s13 = sld [smem:[#allocation16_spill]]  ;;  %s1626_s17 = sld [smem:[#allocation23_spill]] }
 0x2ff   : > { %p850_p4 = scmp.ge.s32.totalorder %s1168_s30, 2 }
 0x304   : > { %s661_s18 = sand.u32 1, %s1625_s13   ;;  %p1627_p12 = scmp.ne.s32.totalorder %s1626_s17, 0 }
 0x305   : > { %s662_s15 = scalar_lea.sflag [#allocation9], %s661_s18 }
 0x306   : > { %p844_p8 = pnand %p850_p4, %p1627_p12 }
 0x308   : > { %1115 = dma.done.wait (!%p844_p8), %s662_s15, 64  }
 0x309   : > { %1117 = vsyncadd (!%p844_p8), %s662_s15, 4294967232  ;;  %s22_s30 = sadd.s32 1, %s1168_s30   ;;  %s1629_s18 = sld [smem:[#allocation17_spill]] }
 0x30a   : > { %p1509_p6 = scmp.ge.s32.totalorder %s22_s30, 10   ;;  %s1630_s25 = sld [smem:[#allocation21_spill]] }
 0x30b   : > { %s1631_s28 = sld [smem:[#allocation24_spill]]  ;;  %s1632_s16 = sld [smem:[#allocation25_spill]] }
 0x30c   : > { %s1633_s19 = smov %s1128_s20  ;;  %s1634_s20 = smov %s1363_s24 }
 0x30d   : > { %s1635_s21 = smov %s1136_s22  ;;  %s1636_s22 = smov %s1140_s23 }
 0x30e   : > { %s1637_s23 = smov %s1360_s2  ;;  %s1638_s24 = smov %s1156_s27 }
 0x30f   : > { %s1639_s26 = smov %s1164_s29  ;;  %s1642_s29 = smov %s1652_s7 }
 0x310   :  { %21 = sbr.rel (!%p1509_p6) target bundleno = 17 (0x11), region = 113 }
 0x311   : > { %s1640_s27 = smov %s1631_s28  ;;  %s1641_s28 = smov %s1632_s16 }
 0x317   :  { %667 = vsyncpa [#allocation8], 1 }
 0x318   :  { %669 = vsyncpa [#allocation8 + $0x1], 1 }
 0x319   :  { %670 = vsyncpa [#allocation11], 1 }
 0x31a   :  { %671 = vsyncpa [#allocation9], 1 }
 0x31b   :  { %673 = vsyncpa [#allocation9 + $0x1], 1 }

</bundles_post_ra>
